<compile_context>
chip_gen: v7x
topology: tpu7x:2x2x1
jax: 0.10.0
libtpu: 0.0.40
codegen_flags: <defaults>
</compile_context>

<pallas_src>
import jax
import jax.numpy as jnp
from jax import lax
from jax.experimental import pallas as pl
from jax.experimental.pallas import tpu as pltpu

# ---- problem sizes (module defaults: number_of_channels=2 → first_layer on) --
N, C_IN, H, W = 2, 2, 16, 16          # NCHW input
C_OUT, KH, KW = 3, 3, 3               # Conv2d(2, 3, kernel_size=(3,3), padding='same')
L = H * W                             # flattened spatial axis (lane-dense, 256)
assert W & (W - 1) == 0, "W must be a power of two for shift-based index math"
LOG2_W = W.bit_length() - 1

NCO = N * C_OUT                       # live stacked rows (co, n) = 6
P = 8                                 # padded row count → one full sublane group
NTAP_CI = KH * KW * C_IN              # 18 packed weight columns


def conv3x3_same_kernel(x_ref, w_ref, b_ref, o_ref):
    """Single-invocation 3x3 'same' conv on a flattened spatial axis.

    x_ref : VMEM (C_IN*P, L)  input, rows ordered (ci, co, n) [rows 6..7 of each
                              ci-block are zero padding], H*W flattened to lanes
    w_ref : VMEM (P, 18)      weights, rows (co, n), cols (tap, ci); pad rows 0
    b_ref : VMEM (P, 1)       bias per (co, n) row; pad rows 0
    o_ref : VMEM (P, L)       output, rows (co, n); rows 6..7 are junk
    """
    x = x_ref[...]                                       # (16, 256) f32
    w_all = w_ref[...]                                   # (8, 18)   f32
    acc = jnp.broadcast_to(b_ref[...], (P, L))           # bias init, one vector op

    # Output-position boundary masks: computed ONCE at (1, L); N/C invariant.
    ii = lax.broadcasted_iota(jnp.int32, (1, L), 1)
    col = jnp.bitwise_and(ii, W - 1)                     # i % W
    row = jnp.right_shift(ii, LOG2_W)                    # i // W
    ok = {(-1, 0): row >= 1,          # source row h-1 exists
          (1, 0): row < H - 1,        # source row h+1 exists
          (0, -1): col >= 1,          # source col w-1 exists
          (0, 1): col < W - 1}        # source col w+1 exists

    taps = [(oy, ox) for oy in (-1, 0, 1) for ox in (-1, 0, 1)]

    def tap_mask(oy, ox):             # pre-combined per-tap mask (None = no mask)
        m = None
        for key in ((oy, 0), (0, ox)):
            if key in ok:
                m = ok[key] if m is None else (m & ok[key])
        return m

    masks = [tap_mask(oy, ox) for (oy, ox) in taps]      # hoisted out of the loop

    for (oy, ox), mask in zip(taps, masks):
        # Tap (oy, ox): out[i] needs x_flat[i + oy*W + ox], zero outside image.
        delta = oy * W + ox
        if delta == 0:
            shifted = x
        else:
            shifted = pltpu.roll(x, shift=(-delta) % L, axis=1)   # XLU, positive axis
        patch = shifted if mask is None else jnp.where(mask, shifted, 0.0)
        t = (oy + 1) * KW + (ox + 1)
        for ci in range(C_IN):
            blk = patch[ci * P:(ci + 1) * P, :]          # (8, 256) vreg-aligned block
            idx = t * C_IN + ci
            # one vector multiply + one vector add across all (co, n) rows
            acc = acc + w_all[:, idx:idx + 1] * blk

    o_ref[...] = acc                                     # single lane-dense store


def first_layer_conv(x, weight, bias):
    """Conv2d(C_IN, C_OUT, 3x3, padding='same'), NCHW, one Pallas invocation."""
    # Input rows ordered (ci, co, n): each ci block is a contiguous, vreg-aligned
    # group of P sublane rows that lines up with the stacked (co, n) accumulator.
    x_flat = x.reshape(N, C_IN, L)
    x_cin = jnp.transpose(x_flat, (1, 0, 2))                            # (C_IN, N, L)
    x_exp = jnp.broadcast_to(x_cin[:, None, :, :], (C_IN, C_OUT, N, L))
    x_exp = x_exp.reshape(C_IN, NCO, L)
    x_exp = jnp.pad(x_exp, ((0, 0), (0, P - NCO), (0, 0))).reshape(C_IN * P, L)

    # Weights packed: rows (co, n), cols (tap, ci); tap = ky*KW + kx (OIHW order).
    w_cols = jnp.transpose(weight, (2, 3, 1, 0)).reshape(NTAP_CI, C_OUT)
    w_rows = jnp.repeat(w_cols.T, N, axis=0)                            # (NCO, 18)
    w_packed = jnp.pad(w_rows, ((0, P - NCO), (0, 0)))                  # (P, 18)

    b_packed = jnp.pad(jnp.repeat(bias, N)[:, None], ((0, P - NCO), (0, 0)))  # (P, 1)

    cost = pl.CostEstimate(
        flops=2 * N * C_OUT * C_IN * KH * KW * H * W,
        transcendentals=0,
        bytes_accessed=4 * (C_IN * P * L + P * L + P * NTAP_CI + P),
    )
    out_pad = pl.pallas_call(
        conv3x3_same_kernel,
        out_shape=jax.ShapeDtypeStruct((P, L), jnp.float32),
        in_specs=[
            pl.BlockSpec(memory_space=pltpu.MemorySpace.VMEM),
            pl.BlockSpec(memory_space=pltpu.MemorySpace.VMEM),
            pl.BlockSpec(memory_space=pltpu.MemorySpace.VMEM),
        ],
        out_specs=pl.BlockSpec(memory_space=pltpu.MemorySpace.VMEM),
        cost_estimate=cost,
    )(x_exp, w_packed, b_packed)

    out = out_pad[:NCO].reshape(C_OUT, N, H, W)        # drop pad rows (layout plumbing)
    return jnp.transpose(out, (1, 0, 2, 3))            # (co, n, H, W) → (N, C_OUT, H, W)


@jax.jit
def fine_tuned_sam_forward(x, weight, bias):
    """FineTunedSAM.forward up to the point that is translatable."""
    y = first_layer_conv(x, weight, bias)
    # torch module does `print(x.shape)` here (host side effect only); y is (N, 3, H, W).
    # TODO(synk): mask_generator.generate(y) not implemented (no Pallas equivalent).
    return y


def _reference_conv(x, weight, bias):
    """Pure-JAX reference (lax conv) for correctness checking."""
    out = lax.conv_general_dilated(
        x, weight,
        window_strides=(1, 1),
        padding="SAME",
        dimension_numbers=("NCHW", "OIHW", "NCHW"),
    )
    return out + bias.reshape(1, C_OUT, 1, 1)


if __name__ == "__main__":
    key = jax.random.PRNGKey(0)
    kx, kw, kb = jax.random.split(key, 3)

    # deterministic synthetic parameters (shapes from nn.Conv2d(2, 3, (3,3)))
    x = jax.random.normal(kx, (N, C_IN, H, W), dtype=jnp.float32)
    weight = jax.random.normal(kw, (C_OUT, C_IN, KH, KW), dtype=jnp.float32) * 0.1
    bias = jax.random.normal(kb, (C_OUT,), dtype=jnp.float32) * 0.1

    out = fine_tuned_sam_forward(x, weight, bias)
    out = jax.block_until_ready(out)

    ref = _reference_conv(x, weight, bias)
    assert out.shape == (N, C_OUT, H, W)
    assert jnp.allclose(out, ref, atol=1e-5, rtol=1e-5), "mismatch vs lax.conv reference"

    print("KERNEL_OK")
</pallas_src>

<mosaic_0001>
module attributes {stable_mosaic.version = 11 : i64} {
  func.func @conv3x3_same_kernel(%arg0: memref<16x256xf32, #tpu.memory_space<vmem>>, %arg1: memref<8x18xf32, #tpu.memory_space<vmem>>, %arg2: memref<8x1xf32, #tpu.memory_space<vmem>>, %arg3: memref<8x256xf32, #tpu.memory_space<vmem>>) attributes {dimension_semantics = [], scalar_prefetch = 0 : i64, scratch_operands = 0 : i64, tpu.core_type = #tpu.core_type<tc>} {
    %c0 = arith.constant 0 : index
    %c0_0 = arith.constant 0 : index
    %0 = vector.load %arg0[%c0, %c0_0] : memref<16x256xf32, #tpu.memory_space<vmem>>, vector<16x256xf32>
    %c0_1 = arith.constant 0 : index
    %c0_2 = arith.constant 0 : index
    %1 = vector.load %arg1[%c0_1, %c0_2] : memref<8x18xf32, #tpu.memory_space<vmem>>, vector<8x18xf32>
    %c0_3 = arith.constant 0 : index
    %c0_4 = arith.constant 0 : index
    %2 = vector.load %arg2[%c0_3, %c0_4] : memref<8x1xf32, #tpu.memory_space<vmem>>, vector<8x1xf32>
    %3 = vector.shape_cast %2 : vector<8x1xf32> to vector<8x1xf32>
    %4 = vector.broadcast %3 : vector<8x1xf32> to vector<8x256xf32>
    %5 = tpu.iota {dimensions = array<i32: 1>} : vector<1x256xi32>
    %c15_i32 = arith.constant 15 : i32
    %6 = vector.broadcast %c15_i32 : i32 to vector<1x256xi32>
    %7 = arith.andi %5, %6 : vector<1x256xi32>
    %c4_i32 = arith.constant 4 : i32
    %8 = vector.broadcast %c4_i32 : i32 to vector<1x256xi32>
    %9 = arith.shrsi %5, %8 : vector<1x256xi32>
    %c1_i32 = arith.constant 1 : i32
    %10 = vector.broadcast %c1_i32 : i32 to vector<1x256xi32>
    %11 = arith.cmpi sge, %9, %10 : vector<1x256xi32>
    %c15_i32_5 = arith.constant 15 : i32
    %12 = vector.broadcast %c15_i32_5 : i32 to vector<1x256xi32>
    %13 = arith.cmpi slt, %9, %12 : vector<1x256xi32>
    %c1_i32_6 = arith.constant 1 : i32
    %14 = vector.broadcast %c1_i32_6 : i32 to vector<1x256xi32>
    %15 = arith.cmpi sge, %7, %14 : vector<1x256xi32>
    %c15_i32_7 = arith.constant 15 : i32
    %16 = vector.broadcast %c15_i32_7 : i32 to vector<1x256xi32>
    %17 = arith.cmpi slt, %7, %16 : vector<1x256xi32>
    %18 = arith.andi %11, %15 : vector<1x256xi1>
    %19 = arith.andi %11, %17 : vector<1x256xi1>
    %20 = arith.andi %13, %15 : vector<1x256xi1>
    %21 = arith.andi %13, %17 : vector<1x256xi1>
    %c17_i32 = arith.constant 17 : i32
    %22 = tpu.dynamic_rotate %0 by %c17_i32 dim 1 : vector<16x256xf32>, i32 -> vector<16x256xf32>
    %cst = arith.constant 0.000000e+00 : f32
    %23 = vector.shape_cast %18 : vector<1x256xi1> to vector<1x256xi1>
    %24 = vector.broadcast %23 : vector<1x256xi1> to vector<16x256xi1>
    %25 = vector.broadcast %cst : f32 to vector<16x256xf32>
    %26 = arith.select %24, %22, %25 : vector<16x256xi1>, vector<16x256xf32>
    %27 = vector.extract_strided_slice %26 {offsets = [0, 0], sizes = [8, 256], strides = [1, 1]} : vector<16x256xf32> to vector<8x256xf32>
    %28 = vector.extract_strided_slice %1 {offsets = [0, 0], sizes = [8, 1], strides = [1, 1]} : vector<8x18xf32> to vector<8x1xf32>
    %29 = vector.broadcast %28 : vector<8x1xf32> to vector<8x256xf32>
    %30 = arith.mulf %29, %27 : vector<8x256xf32>
    %31 = arith.addf %4, %30 : vector<8x256xf32>
    %32 = vector.extract_strided_slice %26 {offsets = [8, 0], sizes = [8, 256], strides = [1, 1]} : vector<16x256xf32> to vector<8x256xf32>
    %33 = vector.extract_strided_slice %1 {offsets = [0, 1], sizes = [8, 1], strides = [1, 1]} : vector<8x18xf32> to vector<8x1xf32>
    %34 = vector.broadcast %33 : vector<8x1xf32> to vector<8x256xf32>
    %35 = arith.mulf %34, %32 : vector<8x256xf32>
    %36 = arith.addf %31, %35 : vector<8x256xf32>
    %c16_i32 = arith.constant 16 : i32
    %37 = tpu.dynamic_rotate %0 by %c16_i32 dim 1 : vector<16x256xf32>, i32 -> vector<16x256xf32>
    %cst_8 = arith.constant 0.000000e+00 : f32
    %38 = vector.shape_cast %11 : vector<1x256xi1> to vector<1x256xi1>
    %39 = vector.broadcast %38 : vector<1x256xi1> to vector<16x256xi1>
    %40 = vector.broadcast %cst_8 : f32 to vector<16x256xf32>
    %41 = arith.select %39, %37, %40 : vector<16x256xi1>, vector<16x256xf32>
    %42 = vector.extract_strided_slice %41 {offsets = [0, 0], sizes = [8, 256], strides = [1, 1]} : vector<16x256xf32> to vector<8x256xf32>
    %43 = vector.extract_strided_slice %1 {offsets = [0, 2], sizes = [8, 1], strides = [1, 1]} : vector<8x18xf32> to vector<8x1xf32>
    %44 = vector.broadcast %43 : vector<8x1xf32> to vector<8x256xf32>
    %45 = arith.mulf %44, %42 : vector<8x256xf32>
    %46 = arith.addf %36, %45 : vector<8x256xf32>
    %47 = vector.extract_strided_slice %41 {offsets = [8, 0], sizes = [8, 256], strides = [1, 1]} : vector<16x256xf32> to vector<8x256xf32>
    %48 = vector.extract_strided_slice %1 {offsets = [0, 3], sizes = [8, 1], strides = [1, 1]} : vector<8x18xf32> to vector<8x1xf32>
    %49 = vector.broadcast %48 : vector<8x1xf32> to vector<8x256xf32>
    %50 = arith.mulf %49, %47 : vector<8x256xf32>
    %51 = arith.addf %46, %50 : vector<8x256xf32>
    %c15_i32_9 = arith.constant 15 : i32
    %52 = tpu.dynamic_rotate %0 by %c15_i32_9 dim 1 : vector<16x256xf32>, i32 -> vector<16x256xf32>
    %cst_10 = arith.constant 0.000000e+00 : f32
    %53 = vector.shape_cast %19 : vector<1x256xi1> to vector<1x256xi1>
    %54 = vector.broadcast %53 : vector<1x256xi1> to vector<16x256xi1>
    %55 = vector.broadcast %cst_10 : f32 to vector<16x256xf32>
    %56 = arith.select %54, %52, %55 : vector<16x256xi1>, vector<16x256xf32>
    %57 = vector.extract_strided_slice %56 {offsets = [0, 0], sizes = [8, 256], strides = [1, 1]} : vector<16x256xf32> to vector<8x256xf32>
    %58 = vector.extract_strided_slice %1 {offsets = [0, 4], sizes = [8, 1], strides = [1, 1]} : vector<8x18xf32> to vector<8x1xf32>
    %59 = vector.broadcast %58 : vector<8x1xf32> to vector<8x256xf32>
    %60 = arith.mulf %59, %57 : vector<8x256xf32>
    %61 = arith.addf %51, %60 : vector<8x256xf32>
    %62 = vector.extract_strided_slice %56 {offsets = [8, 0], sizes = [8, 256], strides = [1, 1]} : vector<16x256xf32> to vector<8x256xf32>
    %63 = vector.extract_strided_slice %1 {offsets = [0, 5], sizes = [8, 1], strides = [1, 1]} : vector<8x18xf32> to vector<8x1xf32>
    %64 = vector.broadcast %63 : vector<8x1xf32> to vector<8x256xf32>
    %65 = arith.mulf %64, %62 : vector<8x256xf32>
    %66 = arith.addf %61, %65 : vector<8x256xf32>
    %c1_i32_11 = arith.constant 1 : i32
    %67 = tpu.dynamic_rotate %0 by %c1_i32_11 dim 1 : vector<16x256xf32>, i32 -> vector<16x256xf32>
    %cst_12 = arith.constant 0.000000e+00 : f32
    %68 = vector.shape_cast %15 : vector<1x256xi1> to vector<1x256xi1>
    %69 = vector.broadcast %68 : vector<1x256xi1> to vector<16x256xi1>
    %70 = vector.broadcast %cst_12 : f32 to vector<16x256xf32>
    %71 = arith.select %69, %67, %70 : vector<16x256xi1>, vector<16x256xf32>
    %72 = vector.extract_strided_slice %71 {offsets = [0, 0], sizes = [8, 256], strides = [1, 1]} : vector<16x256xf32> to vector<8x256xf32>
    %73 = vector.extract_strided_slice %1 {offsets = [0, 6], sizes = [8, 1], strides = [1, 1]} : vector<8x18xf32> to vector<8x1xf32>
    %74 = vector.broadcast %73 : vector<8x1xf32> to vector<8x256xf32>
    %75 = arith.mulf %74, %72 : vector<8x256xf32>
    %76 = arith.addf %66, %75 : vector<8x256xf32>
    %77 = vector.extract_strided_slice %71 {offsets = [8, 0], sizes = [8, 256], strides = [1, 1]} : vector<16x256xf32> to vector<8x256xf32>
    %78 = vector.extract_strided_slice %1 {offsets = [0, 7], sizes = [8, 1], strides = [1, 1]} : vector<8x18xf32> to vector<8x1xf32>
    %79 = vector.broadcast %78 : vector<8x1xf32> to vector<8x256xf32>
    %80 = arith.mulf %79, %77 : vector<8x256xf32>
    %81 = arith.addf %76, %80 : vector<8x256xf32>
    %82 = vector.extract_strided_slice %0 {offsets = [0, 0], sizes = [8, 256], strides = [1, 1]} : vector<16x256xf32> to vector<8x256xf32>
    %83 = vector.extract_strided_slice %1 {offsets = [0, 8], sizes = [8, 1], strides = [1, 1]} : vector<8x18xf32> to vector<8x1xf32>
    %84 = vector.broadcast %83 : vector<8x1xf32> to vector<8x256xf32>
    %85 = arith.mulf %84, %82 : vector<8x256xf32>
    %86 = arith.addf %81, %85 : vector<8x256xf32>
    %87 = vector.extract_strided_slice %0 {offsets = [8, 0], sizes = [8, 256], strides = [1, 1]} : vector<16x256xf32> to vector<8x256xf32>
    %88 = vector.extract_strided_slice %1 {offsets = [0, 9], sizes = [8, 1], strides = [1, 1]} : vector<8x18xf32> to vector<8x1xf32>
    %89 = vector.broadcast %88 : vector<8x1xf32> to vector<8x256xf32>
    %90 = arith.mulf %89, %87 : vector<8x256xf32>
    %91 = arith.addf %86, %90 : vector<8x256xf32>
    %c255_i32 = arith.constant 255 : i32
    %92 = tpu.dynamic_rotate %0 by %c255_i32 dim 1 : vector<16x256xf32>, i32 -> vector<16x256xf32>
    %cst_13 = arith.constant 0.000000e+00 : f32
    %93 = vector.shape_cast %17 : vector<1x256xi1> to vector<1x256xi1>
    %94 = vector.broadcast %93 : vector<1x256xi1> to vector<16x256xi1>
    %95 = vector.broadcast %cst_13 : f32 to vector<16x256xf32>
    %96 = arith.select %94, %92, %95 : vector<16x256xi1>, vector<16x256xf32>
    %97 = vector.extract_strided_slice %96 {offsets = [0, 0], sizes = [8, 256], strides = [1, 1]} : vector<16x256xf32> to vector<8x256xf32>
    %98 = vector.extract_strided_slice %1 {offsets = [0, 10], sizes = [8, 1], strides = [1, 1]} : vector<8x18xf32> to vector<8x1xf32>
    %99 = vector.broadcast %98 : vector<8x1xf32> to vector<8x256xf32>
    %100 = arith.mulf %99, %97 : vector<8x256xf32>
    %101 = arith.addf %91, %100 : vector<8x256xf32>
    %102 = vector.extract_strided_slice %96 {offsets = [8, 0], sizes = [8, 256], strides = [1, 1]} : vector<16x256xf32> to vector<8x256xf32>
    %103 = vector.extract_strided_slice %1 {offsets = [0, 11], sizes = [8, 1], strides = [1, 1]} : vector<8x18xf32> to vector<8x1xf32>
    %104 = vector.broadcast %103 : vector<8x1xf32> to vector<8x256xf32>
    %105 = arith.mulf %104, %102 : vector<8x256xf32>
    %106 = arith.addf %101, %105 : vector<8x256xf32>
    %c241_i32 = arith.constant 241 : i32
    %107 = tpu.dynamic_rotate %0 by %c241_i32 dim 1 : vector<16x256xf32>, i32 -> vector<16x256xf32>
    %cst_14 = arith.constant 0.000000e+00 : f32
    %108 = vector.shape_cast %20 : vector<1x256xi1> to vector<1x256xi1>
    %109 = vector.broadcast %108 : vector<1x256xi1> to vector<16x256xi1>
    %110 = vector.broadcast %cst_14 : f32 to vector<16x256xf32>
    %111 = arith.select %109, %107, %110 : vector<16x256xi1>, vector<16x256xf32>
    %112 = vector.extract_strided_slice %111 {offsets = [0, 0], sizes = [8, 256], strides = [1, 1]} : vector<16x256xf32> to vector<8x256xf32>
    %113 = vector.extract_strided_slice %1 {offsets = [0, 12], sizes = [8, 1], strides = [1, 1]} : vector<8x18xf32> to vector<8x1xf32>
    %114 = vector.broadcast %113 : vector<8x1xf32> to vector<8x256xf32>
    %115 = arith.mulf %114, %112 : vector<8x256xf32>
    %116 = arith.addf %106, %115 : vector<8x256xf32>
    %117 = vector.extract_strided_slice %111 {offsets = [8, 0], sizes = [8, 256], strides = [1, 1]} : vector<16x256xf32> to vector<8x256xf32>
    %118 = vector.extract_strided_slice %1 {offsets = [0, 13], sizes = [8, 1], strides = [1, 1]} : vector<8x18xf32> to vector<8x1xf32>
    %119 = vector.broadcast %118 : vector<8x1xf32> to vector<8x256xf32>
    %120 = arith.mulf %119, %117 : vector<8x256xf32>
    %121 = arith.addf %116, %120 : vector<8x256xf32>
    %c240_i32 = arith.constant 240 : i32
    %122 = tpu.dynamic_rotate %0 by %c240_i32 dim 1 : vector<16x256xf32>, i32 -> vector<16x256xf32>
    %cst_15 = arith.constant 0.000000e+00 : f32
    %123 = vector.shape_cast %13 : vector<1x256xi1> to vector<1x256xi1>
    %124 = vector.broadcast %123 : vector<1x256xi1> to vector<16x256xi1>
    %125 = vector.broadcast %cst_15 : f32 to vector<16x256xf32>
    %126 = arith.select %124, %122, %125 : vector<16x256xi1>, vector<16x256xf32>
    %127 = vector.extract_strided_slice %126 {offsets = [0, 0], sizes = [8, 256], strides = [1, 1]} : vector<16x256xf32> to vector<8x256xf32>
    %128 = vector.extract_strided_slice %1 {offsets = [0, 14], sizes = [8, 1], strides = [1, 1]} : vector<8x18xf32> to vector<8x1xf32>
    %129 = vector.broadcast %128 : vector<8x1xf32> to vector<8x256xf32>
    %130 = arith.mulf %129, %127 : vector<8x256xf32>
    %131 = arith.addf %121, %130 : vector<8x256xf32>
    %132 = vector.extract_strided_slice %126 {offsets = [8, 0], sizes = [8, 256], strides = [1, 1]} : vector<16x256xf32> to vector<8x256xf32>
    %133 = vector.extract_strided_slice %1 {offsets = [0, 15], sizes = [8, 1], strides = [1, 1]} : vector<8x18xf32> to vector<8x1xf32>
    %134 = vector.broadcast %133 : vector<8x1xf32> to vector<8x256xf32>
    %135 = arith.mulf %134, %132 : vector<8x256xf32>
    %136 = arith.addf %131, %135 : vector<8x256xf32>
    %c239_i32 = arith.constant 239 : i32
    %137 = tpu.dynamic_rotate %0 by %c239_i32 dim 1 : vector<16x256xf32>, i32 -> vector<16x256xf32>
    %cst_16 = arith.constant 0.000000e+00 : f32
    %138 = vector.shape_cast %21 : vector<1x256xi1> to vector<1x256xi1>
    %139 = vector.broadcast %138 : vector<1x256xi1> to vector<16x256xi1>
    %140 = vector.broadcast %cst_16 : f32 to vector<16x256xf32>
    %141 = arith.select %139, %137, %140 : vector<16x256xi1>, vector<16x256xf32>
    %142 = vector.extract_strided_slice %141 {offsets = [0, 0], sizes = [8, 256], strides = [1, 1]} : vector<16x256xf32> to vector<8x256xf32>
    %143 = vector.extract_strided_slice %1 {offsets = [0, 16], sizes = [8, 1], strides = [1, 1]} : vector<8x18xf32> to vector<8x1xf32>
    %144 = vector.broadcast %143 : vector<8x1xf32> to vector<8x256xf32>
    %145 = arith.mulf %144, %142 : vector<8x256xf32>
    %146 = arith.addf %136, %145 : vector<8x256xf32>
    %147 = vector.extract_strided_slice %141 {offsets = [8, 0], sizes = [8, 256], strides = [1, 1]} : vector<16x256xf32> to vector<8x256xf32>
    %148 = vector.extract_strided_slice %1 {offsets = [0, 17], sizes = [8, 1], strides = [1, 1]} : vector<8x18xf32> to vector<8x1xf32>
    %149 = vector.broadcast %148 : vector<8x1xf32> to vector<8x256xf32>
    %150 = arith.mulf %149, %147 : vector<8x256xf32>
    %151 = arith.addf %146, %150 : vector<8x256xf32>
    %c0_17 = arith.constant 0 : index
    %c0_18 = arith.constant 0 : index
    %152 = vector.load %arg3[%c0_17, %c0_18] : memref<8x256xf32, #tpu.memory_space<vmem>>, vector<8x256xf32>
    tpu.vector_store %arg3[%c0_17, %c0_18], %151 {strides = array<i32>} : memref<8x256xf32, #tpu.memory_space<vmem>>, vector<8x256xf32>,
    return
  }
}

</mosaic_0001>

<bundles_post_ra>
// kernel: fine_tuned_sam_forward.1
= control target key start
LH: loop header
LB: loop body
LE: loop exit
PB: predicated region body
PF: predicated region fallthrough
CT: control target
= control target key end

     0   :  { %v412_v0 = vmov 0   ;;  %s413_s16 = smov 17   ;;  %v414_v7 = vmov 1   ;;  %s415_s24 = smov 16   ;;  %v416_v8 = vmov 3   ;;  %v417_v9 = vmov 2   ;;  %s799_s2 = inlined_call_operand.vmem [shape: f32[8,1], index: 2, kind: input, shape index: {}]   ;;  %s800_s0 = inlined_call_operand.vmem [shape: f32[16,256], index: 0, kind: input, shape index: {}]   ;;  %s801_s1 = inlined_call_operand.vmem [shape: f32[8,18], index: 1, kind: input, shape index: {}]   ;;  %s802_s3 = inlined_call_operand.vmem [shape: f32[8,256], index: 3, kind: output, shape index: {}]  }
   0x1   :  { %393 = vset.pattern.permute.xlu0 %v412_v0  ;;  %v19_v1 = vld [vmem:[%s799_s2] sm:$0xff]  ;;  %v464_v2 = vld [vmem:[%s800_s0 + $0x10] sm:$0xff]  ;;  %394 = vset.pattern.permute.xlu1 %v412_v0  ;;  %v470_v3 = vld [vmem:[%s800_s0 + $0x8] sm:$0xff]  ;;  %v419_v10 = vmov 5   ;;  %v420_v11 = vmov 4   ;;  %v421_v12 = vmov 8   ;;  %v25_v24 = vlaneseq }
   0x2   :  { %22 = vperm.xlu0 %393, %v19_v1   ;;  %50 = vrot.lane.b32.xlu1 %v464_v2, %s413_s16  ;;  %v475_v4 = vld [vmem:[%s800_s0] sm:$0xff]  ;;  %v487_v6 = vld [vmem:[%s800_s0 + $0x18] sm:$0xff]  ;;  %s418_s0 = smov 15   ;;  %v422_v13 = vmov 6   ;;  %v423_v14 = vmov 9   ;;  %v424_v15 = vmov 7  }
   0x3   :  { %v482_v5 = vld [vmem:[%s801_s1] sm:$0xff]  ;;  %v425_v16 = vmov 10   ;;  %s426_s1 = smov 1   ;;  %v427_v17 = vmov 11   ;;  %s428_s25 = smov 127   ;;  %v429_v18 = vmov 13  }
   0x4   :  { %v430_v19 = vmov 14   ;;  %v431_v20 = vmov 15   ;;  %v432_v21 = vmov 16   ;;  %v433_v22 = vmov 12   ;;  %s435_s26 = smov 111   ;;  %s436_s27 = smov 113  }
   0x5   :  { %v434_v23 = vmov 17   ;;  %s437_s28 = smov 112   ;;  %v534_v25 = vand.u32 127, %v25_v24 }
   0x6   :  { %52 = vrot.lane.b32.xlu1 %v470_v3, %s413_s16  ;;  %48 = vrot.lane.b32.xlu0 %v475_v4, %s413_s16 }
   0x7   :  { %395 = vset.pattern.permute.xlu0 %v414_v7  ;;  %v538_v26 = vadd.s32 128, %v534_v25  ;;  %v28_v27 = vand.u32 15, %v534_v25  ;;  %v30_v28 = vshra.s32 %v534_v25, 4  ;;  %vm56_vm2 = vcmp.lt.s32.totalorder %v534_v25, 17 }
   0x8   :  { %vm94_vm7 = vcmp.lt.s32.totalorder %v534_v25, 16  ;;  %vm131_vm9 = vcmp.lt.s32.totalorder %v534_v25, 15  ;;  %vm168_vm13 = vcmp.lt.s32.totalorder %v534_v25, 1  ;;  %vm221_vm14 = vcmp.lt.s32.totalorder %v534_v25, 127 }
   0x9   :  { %v29_v30 = vand.u32 15, %v538_v26  ;;  %v31_v31 = vshra.s32 %v538_v26, 4  ;;  %vm547_vm0 = vcmp.ge.s32.totalorder %v30_v28, 1  ;;  %vm551_vm1 = vcmp.ge.s32.totalorder %v28_v27, 1 }
   0xa   :  { %71 = vperm.xlu1 %394, %v482_v5   ;;  %54 = vrot.lane.b32.xlu0 %v487_v6, %s413_s16  ;;  %vm40_vm5 = vmand %vm547_vm0, %vm551_vm1  ;;  %vm591_vm8 = vcmp.lt.s32.totalorder %v28_v27, 15  ;;  %vm668_vm15 = vcmp.lt.s32.totalorder %v30_v28, 15 }
   0xb   :  { %vm558_vm3 = vcmp.ge.s32.totalorder %v31_v31, 1  ;;  %vm562_vm4 = vcmp.ge.s32.totalorder %v29_v30, 1  ;;  %vm596_vm10 = vcmp.lt.s32.totalorder %v29_v30, 15  ;;  %vm42_vm11 = vmand %vm547_vm0, %vm591_vm8 }
   0xc   :  { %vm41_vm6 = vmand %vm558_vm3, %vm562_vm4 }
   0xd   :  { %vm43_vm12 = vmand %vm558_vm3, %vm596_vm10 }
   0xe   :  { %86 = vrot.lane.b32.xlu1 %v475_v4, %s415_s24  ;;  %79 = vperm.xlu0 %395, %v482_v5  }
   0xf   :  { %397 = vset.pattern.permute.xlu1 %v416_v8 }
  0x12   :  { %88 = vrot.lane.b32.xlu1 %v464_v2, %s415_s24  ;;  %90 = vrot.lane.b32.xlu0 %v470_v3, %s415_s24 }
  0x13   :  { %396 = vset.pattern.permute.xlu0 %v417_v9 }
  0x16   :  { %92 = vrot.lane.b32.xlu1 %v487_v6, %s415_s24  ;;  %108 = vperm.xlu0 %396, %v482_v5  }
  0x1a   :  { %116 = vperm.xlu1 %397, %v482_v5   ;;  %125 = vrot.lane.b32.xlu0 %v464_v2, %s418_s0 }
  0x1b   :  { %399 = vset.pattern.permute.xlu0 %v419_v10 }
  0x1e   :  { %123 = vrot.lane.b32.xlu1 %v475_v4, %s418_s0  ;;  %129 = vrot.lane.b32.xlu0 %v487_v6, %s418_s0 }
  0x1f   :  { %398 = vset.pattern.permute.xlu1 %v420_v11 }
  0x22   :  { %127 = vrot.lane.b32.xlu1 %v470_v3, %s418_s0  ;;  %153 = vperm.xlu0 %399, %v482_v5  }
  0x26   :  { %145 = vperm.xlu1 %398, %v482_v5   ;;  %402 = vset.pattern.permute.xlu0 %v421_v12 }
  0x27   :  { %198 = vperm.xlu0 %402, %v482_v5  }
  0x2a   :  { %400 = vset.pattern.permute.xlu1 %v422_v13 }
  0x2b   :  { %182 = vperm.xlu1 %400, %v482_v5   ;;  %403 = vset.pattern.permute.xlu0 %v423_v14 }
  0x2c   :  { %206 = vperm.xlu0 %403, %v482_v5  }
  0x2f   :  { %401 = vset.pattern.permute.xlu1 %v424_v15 }
  0x30   :  { %190 = vperm.xlu1 %401, %v482_v5   ;;  %404 = vset.pattern.permute.xlu0 %v425_v16 }
  0x31   :  { %235 = vperm.xlu0 %404, %v482_v5  }
  0x34   :  { %160 = vrot.lane.b32.xlu1 %v475_v4, %s426_s1 }
  0x35   :  { %405 = vset.pattern.permute.xlu1 %v427_v17  ;;  %213 = vrot.lane.b32.xlu0 %v475_v4, %s428_s25 }
  0x36   :  { %407 = vset.pattern.permute.xlu0 %v429_v18 }
  0x38   :  { %164 = vrot.lane.b32.xlu1 %v470_v3, %s426_s1 }
  0x39   :  { %280 = vperm.xlu0 %407, %v482_v5  }
  0x3c   :  { %162 = vrot.lane.b32.xlu1 %v464_v2, %s426_s1 }
  0x3d   :  { %408 = vset.pattern.permute.xlu0 %v430_v19 }
  0x3e   :  { %309 = vperm.xlu0 %408, %v482_v5  }
  0x40   :  { %166 = vrot.lane.b32.xlu1 %v487_v6, %s426_s1 }
  0x42   :  { %409 = vset.pattern.permute.xlu0 %v431_v20 }
  0x43   :  { %317 = vperm.xlu0 %409, %v482_v5  }
  0x44   :  { %243 = vperm.xlu1 %405, %v482_v5  }
  0x47   :  { %410 = vset.pattern.permute.xlu0 %v432_v21 }
  0x48   :  { %406 = vset.pattern.permute.xlu1 %v433_v22  ;;  %346 = vperm.xlu0 %410, %v482_v5  }
  0x49   :  { %272 = vperm.xlu1 %406, %v482_v5  }
  0x4c   :  { %411 = vset.pattern.permute.xlu0 %v434_v23 }
  0x4d   :  { %217 = vrot.lane.b32.xlu1 %v470_v3, %s428_s25  ;;  %354 = vperm.xlu0 %411, %v482_v5  }
  0x51   :  { %215 = vrot.lane.b32.xlu1 %v464_v2, %s428_s25  ;;  %324 = vrot.lane.b32.xlu0 %v475_v4, %s435_s26 }
  0x55   :  { %219 = vrot.lane.b32.xlu1 %v487_v6, %s428_s25  ;;  %326 = vrot.lane.b32.xlu0 %v464_v2, %s435_s26 }
  0x59   :  { %250 = vrot.lane.b32.xlu1 %v475_v4, %s436_s27 }
  0x5d   :  { %254 = vrot.lane.b32.xlu1 %v470_v3, %s436_s27 }
  0x61   :  { %252 = vrot.lane.b32.xlu1 %v464_v2, %s436_s27 }
  0x65   :  { %256 = vrot.lane.b32.xlu1 %v487_v6, %s436_s27 }
  0x69   :  { %287 = vrot.lane.b32.xlu1 %v475_v4, %s437_s28 }
  0x6d   :  { %291 = vrot.lane.b32.xlu1 %v470_v3, %s437_s28 }
  0x71   :  { %289 = vrot.lane.b32.xlu1 %v464_v2, %s437_s28 }
  0x74   :  { %v51_v29 = vpop.permute.xlu1 %50 }
  0x75   :  { %293 = vrot.lane.b32.xlu1 %v487_v6, %s437_s28 }
  0x78   :  { %v53_v37 = vpop.permute.xlu1 %52 }
  0x79   :  { %328 = vrot.lane.b32.xlu1 %v470_v3, %s435_s26 }
  0x7d   :  { %330 = vrot.lane.b32.xlu1 %v487_v6, %s435_s26 }
  0x81   :  { %v23_v32 = vpop.permute.xlu0 %22 }
  0x85   :  { %v49_v38 = vpop.permute.xlu0 %48 }
  0x86   :  { %v57_v39 = vsel %vm56_vm2, %v49_v38, %v53_v37  ;;  %v59_v40 = vsel %vm56_vm2, %v53_v37, %v49_v38 }
  0x87   :  { %v65_v42 = vsel %vm40_vm5, %v59_v40, 0.0  ;;  %v66_v43 = vsel %vm41_vm6, %v57_v39, 0.0 }
  0x89   :  { %v72_v41 = vpop.permute.xlu1 %71  ;;  %v55_v44 = vpop.permute.xlu0 %54 }
  0x8a   :  { %v74_v45 = vmul.f32 %v72_v41, %v65_v42  ;;  %v75_v46 = vmul.f32 %v72_v41, %v66_v43  ;;  %v58_v47 = vsel %vm56_vm2, %v51_v29, %v55_v44  ;;  %v60_v48 = vsel %vm56_vm2, %v55_v44, %v51_v29 }
  0x8b   :  { %v67_v50 = vsel %vm40_vm5, %v60_v48, 0.0  ;;  %v68_v51 = vsel %vm41_vm6, %v58_v47, 0.0  ;;  %vm258_vm2 = vcmp.lt.s32.totalorder %v534_v25, 113  ;;  %vm295_vm6 = vcmp.lt.s32.totalorder %v534_v25, 112 }
  0x8c   :  { %v76_v53 = vadd.f32 %v74_v45, %v23_v32  ;;  %v77_v54 = vadd.f32 %v75_v46, %v23_v32 }
  0x8d   :  { %v87_v49 = vpop.permute.xlu1 %86  ;;  %v80_v52 = vpop.permute.xlu0 %79 }
  0x8e   :  { %v82_v55 = vmul.f32 %v80_v52, %v67_v50  ;;  %v83_v56 = vmul.f32 %v80_v52, %v68_v51 }
  0x90   :  { %v84_v57 = vadd.f32 %v82_v55, %v76_v53  ;;  %v85_v58 = vadd.f32 %v83_v56, %v77_v54 }
  0x91   :  { %v89_v59 = vpop.permute.xlu1 %88  ;;  %v91_v60 = vpop.permute.xlu0 %90 }
  0x92   :  { %v95_v61 = vsel %vm94_vm7, %v87_v49, %v91_v60  ;;  %v97_v62 = vsel %vm94_vm7, %v91_v60, %v87_v49 }
  0x93   :  { %v103_v0 = vsel %vm547_vm0, %v97_v62, 0.0  ;;  %v104_v1 = vsel %vm558_vm3, %v95_v61, 0.0 }
  0x95   :  { %v93_v63 = vpop.permute.xlu1 %92  ;;  %v109_v5 = vpop.permute.xlu0 %108 }
  0x96   :  { %v96_v7 = vsel %vm94_vm7, %v89_v59, %v93_v63  ;;  %v98_v8 = vsel %vm94_vm7, %v93_v63, %v89_v59  ;;  %v111_v9 = vmul.f32 %v109_v5, %v103_v0  ;;  %v112_v10 = vmul.f32 %v109_v5, %v104_v1 }
  0x97   :  { %v105_v13 = vsel %vm547_vm0, %v98_v8, 0.0  ;;  %v106_v14 = vsel %vm558_vm3, %v96_v7, 0.0  ;;  %vm680_vm0 = vcmp.lt.s32.totalorder %v31_v31, 15  ;;  %vm44_vm3 = vmand %vm668_vm15, %vm551_vm1 }
  0x98   :  { %v113_v11 = vadd.f32 %v111_v9, %v84_v57  ;;  %v114_v12 = vadd.f32 %v112_v10, %v85_v58  ;;  %vm45_vm5 = vmand %vm680_vm0, %vm562_vm4 }
  0x99   :  { %v117_v15 = vpop.permute.xlu1 %116  ;;  %v126_v43 = vpop.permute.xlu0 %125  ;;  %vm47_vm7 = vmand %vm680_vm0, %vm596_vm10 }
  0x9a   :  { %v119_v16 = vmul.f32 %v117_v15, %v105_v13  ;;  %v120_v17 = vmul.f32 %v117_v15, %v106_v14 }
  0x9c   :  { %v121_v18 = vadd.f32 %v119_v16, %v113_v11  ;;  %v122_v19 = vadd.f32 %v120_v17, %v114_v12 }
  0x9d   :  { %v124_v20 = vpop.permute.xlu1 %123  ;;  %v130_v45 = vpop.permute.xlu0 %129 }
  0x9e   :  { %v133_v60 = vsel %vm131_vm9, %v126_v43, %v130_v45  ;;  %v135_v61 = vsel %vm131_vm9, %v130_v45, %v126_v43 }
  0x9f   :  { %v142_v1 = vsel %vm42_vm11, %v135_v61, 0.0  ;;  %v143_v5 = vsel %vm43_vm12, %v133_v60, 0.0 }
  0xa1   :  { %v128_v23 = vpop.permute.xlu1 %127  ;;  %v154_v48 = vpop.permute.xlu0 %153 }
  0xa2   :  { %v132_v24 = vsel %vm131_vm9, %v124_v20, %v128_v23  ;;  %v134_v27 = vsel %vm131_vm9, %v128_v23, %v124_v20  ;;  %v156_v12 = vmul.f32 %v154_v48, %v142_v1  ;;  %v157_v13 = vmul.f32 %v154_v48, %v143_v5 }
  0xa3   :  { %v140_v29 = vsel %vm42_vm11, %v134_v27, 0.0  ;;  %v141_v30 = vsel %vm43_vm12, %v132_v24, 0.0 }
  0xa5   :  { %v146_v32 = vpop.permute.xlu1 %145 }
  0xa6   :  { %v148_v37 = vmul.f32 %v146_v32, %v140_v29  ;;  %v149_v38 = vmul.f32 %v146_v32, %v141_v30  ;;  %v199_v50 = vpop.permute.xlu0 %198 }
  0xa7   :  { %v201_v43 = vmul.f32 %v199_v50, %v475_v4 }
  0xa8   :  { %v150_v39 = vadd.f32 %v148_v37, %v121_v18  ;;  %v151_v40 = vadd.f32 %v149_v38, %v122_v19 }
  0xaa   :  { %v183_v41 = vpop.permute.xlu1 %182  ;;  %v158_v18 = vadd.f32 %v156_v12, %v150_v39  ;;  %v159_v19 = vadd.f32 %v157_v13, %v151_v40  ;;  %v202_v39 = vmul.f32 %v199_v50, %v470_v3 }
  0xab   :  { %v207_v52 = vpop.permute.xlu0 %206 }
  0xac   :  { %v210_v50 = vmul.f32 %v207_v52, %v487_v6 }
  0xaf   :  { %v191_v42 = vpop.permute.xlu1 %190 }
  0xb0   :  { %v236_v54 = vpop.permute.xlu0 %235 }
  0xb3   :  { %v161_v44 = vpop.permute.xlu1 %160 }
  0xb4   :  { %v214_v57 = vpop.permute.xlu0 %213 }
  0xb7   :  { %v165_v46 = vpop.permute.xlu1 %164 }
  0xb8   :  { %v626_v59 = vpop.permute.xlu0 %280  ;;  %v169_v63 = vsel %vm168_vm13, %v161_v44, %v165_v46  ;;  %v171_v0 = vsel %vm168_vm13, %v165_v46, %v161_v44 }
  0xb9   :  { %v177_v11 = vsel %vm551_vm1, %v171_v0, 0.0  ;;  %v178_v33 = vsel %vm562_vm4, %v169_v63, 0.0 }
  0xba   :  { %v185_v15 = vmul.f32 %v183_v41, %v177_v11  ;;  %v186_v16 = vmul.f32 %v183_v41, %v178_v33 }
  0xbb   :  { %v163_v47 = vpop.permute.xlu1 %162 }
  0xbc   :  { %v187_v27 = vadd.f32 %v185_v15, %v158_v18  ;;  %v188_v29 = vadd.f32 %v186_v16, %v159_v19 }
  0xbd   :  { %v643_v10 = vpop.permute.xlu0 %309 }
  0xbf   :  { %v167_v49 = vpop.permute.xlu1 %166 }
  0xc0   :  { %v170_v7 = vsel %vm168_vm13, %v163_v47, %v167_v49  ;;  %v172_v8 = vsel %vm168_vm13, %v167_v49, %v163_v47  ;;  %v209_v49 = vmul.f32 %v207_v52, %v464_v2 }
  0xc1   :  { %v179_v35 = vsel %vm551_vm1, %v172_v8, 0.0  ;;  %v180_v14 = vsel %vm562_vm4, %v170_v7, 0.0  ;;  %vm332_vm1 = vcmp.lt.s32.totalorder %v534_v25, 111  ;;  %vm46_vm4 = vmand %vm668_vm15, %vm591_vm8 }
  0xc2   :  { %v193_v20 = vmul.f32 %v191_v42, %v179_v35  ;;  %v194_v23 = vmul.f32 %v191_v42, %v180_v14  ;;  %v654_v24 = vpop.permute.xlu0 %317 }
  0xc3   :  { %v622_v51 = vpop.permute.xlu1 %243 }
  0xc4   :  { %v195_v38 = vadd.f32 %v193_v20, %v187_v27  ;;  %v196_v41 = vadd.f32 %v194_v23, %v188_v29 }
  0xc6   :  { %v203_v28 = vadd.f32 %v201_v43, %v195_v38  ;;  %v204_v48 = vadd.f32 %v202_v39, %v196_v41 }
  0xc7   :  { %v672_v46 = vpop.permute.xlu0 %346 }
  0xc8   :  { %v624_v53 = vpop.permute.xlu1 %272 }
  0xcc   :  { %v218_v55 = vpop.permute.xlu1 %217  ;;  %v355_v61 = vpop.permute.xlu0 %354 }
  0xcd   :  { %v222_v32 = vsel %vm221_vm14, %v214_v57, %v218_v55  ;;  %v224_v37 = vsel %vm221_vm14, %v218_v55, %v214_v57 }
  0xce   :  { %v230_v40 = vsel %vm591_vm8, %v222_v32, 0.0  ;;  %v231_v42 = vsel %vm596_vm10, %v224_v37, 0.0 }
  0xcf   :  { %v238_v55 = vmul.f32 %v236_v54, %v230_v40  ;;  %v239_v57 = vmul.f32 %v236_v54, %v231_v42  ;;  %v211_v54 = vadd.f32 %v209_v49, %v203_v28 }
  0xd0   :  { %v216_v56 = vpop.permute.xlu1 %215  ;;  %v325_v18 = vpop.permute.xlu0 %324 }
  0xd1   :  { %v240_v5 = vadd.f32 %v238_v55, %v211_v54 }
  0xd4   :  { %v220_v58 = vpop.permute.xlu1 %219 }
  0xd5   :  { %v223_v4 = vsel %vm221_vm14, %v216_v56, %v220_v58  ;;  %v225_v3 = vsel %vm221_vm14, %v220_v58, %v216_v56  ;;  %v212_v56 = vadd.f32 %v210_v50, %v204_v48 }
  0xd6   :  { %v232_v26 = vsel %vm591_vm8, %v223_v4, 0.0  ;;  %v233_v31 = vsel %vm596_vm10, %v225_v3, 0.0 }
  0xd7   :  { %v246_v63 = vmul.f32 %v622_v51, %v232_v26  ;;  %v247_v0 = vmul.f32 %v622_v51, %v233_v31  ;;  %v241_v7 = vadd.f32 %v239_v57, %v212_v56 }
  0xd8   :  { %v251_v62 = vpop.permute.xlu1 %250 }
  0xd9   :  { %v248_v35 = vadd.f32 %v246_v63, %v240_v5  ;;  %v249_v34 = vadd.f32 %v247_v0, %v241_v7 }
  0xdc   :  { %v255_v9 = vpop.permute.xlu1 %254 }
  0xdd   :  { %v259_v2 = vsel %vm258_vm2, %v251_v62, %v255_v9  ;;  %v261_v6 = vsel %vm258_vm2, %v255_v9, %v251_v62 }
  0xde   :  { %v267_v62 = vsel %vm44_vm3, %v259_v2, 0.0  ;;  %v268_v1 = vsel %vm45_vm5, %v261_v6, 0.0 }
  0xdf   :  { %v275_v12 = vmul.f32 %v624_v53, %v267_v62  ;;  %v276_v13 = vmul.f32 %v624_v53, %v268_v1 }
  0xe0   :  { %v253_v17 = vpop.permute.xlu1 %252 }
  0xe1   :  { %v277_v20 = vadd.f32 %v275_v12, %v248_v35  ;;  %v278_v23 = vadd.f32 %v276_v13, %v249_v34 }
  0xe4   :  { %v257_v30 = vpop.permute.xlu1 %256 }
  0xe5   :  { %v260_v58 = vsel %vm258_vm2, %v253_v17, %v257_v30  ;;  %v262_v60 = vsel %vm258_vm2, %v257_v30, %v253_v17 }
  0xe6   :  { %v269_v51 = vsel %vm44_vm3, %v260_v58, 0.0  ;;  %v270_v9 = vsel %vm45_vm5, %v262_v60, 0.0 }
  0xe7   :  { %v283_v14 = vmul.f32 %v626_v59, %v269_v51  ;;  %v284_v15 = vmul.f32 %v626_v59, %v270_v9 }
  0xe8   :  { %v288_v45 = vpop.permute.xlu1 %287 }
  0xe9   :  { %v285_v32 = vadd.f32 %v283_v14, %v277_v20  ;;  %v286_v37 = vadd.f32 %v284_v15, %v278_v23 }
  0xec   :  { %v292_v52 = vpop.permute.xlu1 %291 }
  0xed   :  { %v296_v11 = vsel %vm295_vm6, %v288_v45, %v292_v52  ;;  %v298_v33 = vsel %vm295_vm6, %v292_v52, %v288_v45  ;;  %v327_v45 = vpop.permute.xlu0 %326 }
  0xee   :  { %v304_v36 = vsel %vm668_vm15, %v296_v11, 0.0  ;;  %v305_v16 = vsel %vm680_vm0, %v298_v33, 0.0 }
  0xef   :  { %v312_v29 = vmul.f32 %v643_v10, %v304_v36  ;;  %v313_v30 = vmul.f32 %v643_v10, %v305_v16 }
  0xf0   :  { %v290_v8 = vpop.permute.xlu1 %289 }
  0xf1   :  { %v315_v4 = vadd.f32 %v313_v30, %v286_v37 }
  0xf4   :  { %v294_v17 = vpop.permute.xlu1 %293 }
  0xf5   :  { %v297_v19 = vsel %vm295_vm6, %v290_v8, %v294_v17  ;;  %v299_v53 = vsel %vm295_vm6, %v294_v17, %v290_v8 }
  0xf6   :  { %v306_v59 = vsel %vm668_vm15, %v297_v19, 0.0  ;;  %v307_v27 = vsel %vm680_vm0, %v299_v53, 0.0 }
  0xf7   :  { %v320_v41 = vmul.f32 %v654_v24, %v306_v59  ;;  %v321_v43 = vmul.f32 %v654_v24, %v307_v27  ;;  %v314_v24 = vadd.f32 %v312_v29, %v285_v32 }
  0xf8   :  { %v329_v38 = vpop.permute.xlu1 %328 }
  0xf9   :  { %v333_v39 = vsel %vm332_vm1, %v325_v18, %v329_v38  ;;  %v335_v40 = vsel %vm332_vm1, %v329_v38, %v325_v18  ;;  %v322_v49 = vadd.f32 %v320_v41, %v314_v24  ;;  %v323_v50 = vadd.f32 %v321_v43, %v315_v4 }
  0xfa   :  { %v341_v10 = vsel %vm46_vm4, %v333_v39, 0.0  ;;  %v342_v42 = vsel %vm47_vm7, %v335_v40, 0.0 }
  0xfb   :  { %v349_v3 = vmul.f32 %v672_v46, %v341_v10  ;;  %v350_v28 = vmul.f32 %v672_v46, %v342_v42 }
  0xfc   :  { %v331_v48 = vpop.permute.xlu1 %330 }
  0xfd   :  { %v334_v55 = vsel %vm332_vm1, %v327_v45, %v331_v48  ;;  %v336_v57 = vsel %vm332_vm1, %v331_v48, %v327_v45  ;;  %v351_v31 = vadd.f32 %v349_v3, %v322_v49  ;;  %v352_v2 = vadd.f32 %v350_v28, %v323_v50 }
  0xfe   :  { %v343_v26 = vsel %vm46_vm4, %v334_v55, 0.0  ;;  %v344_v46 = vsel %vm47_vm7, %v336_v57, 0.0 }
  0xff   :  { %v357_v6 = vmul.f32 %v355_v61, %v343_v26  ;;  %v358_v52 = vmul.f32 %v355_v61, %v344_v46 }
 0x101   :  { %v359_v54 = vadd.f32 %v357_v6, %v351_v31  ;;  %v360_v56 = vadd.f32 %v358_v52, %v352_v2 }
 0x103   :  { %361 = vst [vmem:[%s802_s3] sm:$0xff] %v359_v54  ;;  %362 = vst [vmem:[%s802_s3 + $0x8] sm:$0xff] %v360_v56 }

</bundles_post_ra>
